<compile_context>
chip_gen: v6e
topology: v6e:2x2x1
jax: 0.10.0
libtpu: 0.0.40
codegen_flags: <defaults>
</compile_context>

<pallas_src>
import numpy as np
import jax
import jax.numpy as jnp
from jax.experimental import pallas as pl
from jax.experimental.pallas import tpu as pltpu

# ----------------------------------------------------------------------------
# Synthetic GraphHomologicalStructure (tiny, deterministic)
# ----------------------------------------------------------------------------
NUM_NODES = 8            # number of conv output positions per sample (L // 2)
NUM_CHANNELS = 4         # num_convolutional_channels
NUM_EDGES = 12
NUM_TRIANGLES = 6
NUM_TETRAHEDRA = 2
NUM_CLASSES = 3
SEQ_LEN = 2 * NUM_NODES  # Conv1d(kernel_size=2, stride=2) -> NUM_NODES outputs
BATCH = 2

FEAT = 128               # lane width of every padded activation / weight tile

# Lane offsets for the packed edges/triangles/tetrahedra activation.
TRI_LANE = NUM_EDGES                     # 12
TET_LANE = NUM_EDGES + NUM_TRIANGLES     # 18

# Parameter-slab row layout.  Every segment starts on a 16-row boundary so the
# bf16 (16,128) sublane tiling never forces a relayout of a weight slice.
_BIAS_ROWS = 16                       # rows 0..4 used (conv/edge/tri/tet/readout bias)
ROW_WCONV = _BIAS_ROWS                # (SEQ_LEN, 128) block-diagonal conv-as-matmul
ROW_WNE = ROW_WCONV + SEQ_LEN         # (128, 128) nodes(ch)->edges   (out lanes 0..11)
ROW_WET = ROW_WNE + FEAT              # (128, 128) edges->triangles   (out lanes 12..17)
ROW_WTT = ROW_WET + FEAT              # (128, 128) tri->tetrahedra    (in 12..17, out 18..19)
ROW_WR = ROW_WTT + FEAT               # (128, 128) fused readout      (in lanes 0..19)
SLAB_ROWS = ROW_WR + FEAT             # 16 + 16 + 4*128 = 544 rows


def _round_up(a, m):
    return (a + m - 1) // m * m


def _cdiv(a, m):
    return -(-a // m)


def build_structure_masks():
    """Deterministic sparse connectivity masks (node level)."""
    m_ne = np.zeros((NUM_NODES, NUM_EDGES), np.float32)
    for e in range(NUM_EDGES):
        m_ne[e % NUM_NODES, e] = 1.0
        m_ne[(e + 3) % NUM_NODES, e] = 1.0
    m_et = np.zeros((NUM_EDGES, NUM_TRIANGLES), np.float32)
    for t in range(NUM_TRIANGLES):
        for j in range(3):
            m_et[(t + j) % NUM_EDGES, t] = 1.0
    m_tt = np.zeros((NUM_TRIANGLES, NUM_TETRAHEDRA), np.float32)
    for k in range(NUM_TETRAHEDRA):
        for j in range(3):
            m_tt[(3 * k + j) % NUM_TRIANGLES, k] = 1.0
    return jnp.asarray(m_ne), jnp.asarray(m_et), jnp.asarray(m_tt)


def init_params(key):
    ks = jax.random.split(key, 13)

    def lin(k, fan_in, shape):
        bound = 1.0 / np.sqrt(float(fan_in))
        return jax.random.uniform(k, shape, jnp.float32, -bound, bound)

    m_ne, m_et, m_tt = build_structure_masks()
    node_feat = NUM_NODES * NUM_CHANNELS

    p = {}
    # Conv1d(in=1, out=C, kernel=2, stride=2): weight stored as (2, C)
    p["wc"] = lin(ks[0], 2, (2, NUM_CHANNELS))
    p["bc"] = lin(ks[1], 2, (NUM_CHANNELS,))
    # HNN nodes->edges, per conv channel: (C, N, E), masked by m_ne
    # (the "convoluted" expansion repeats each node's connectivity per channel).
    p["wne"] = lin(ks[2], node_feat, (NUM_CHANNELS, NUM_NODES, NUM_EDGES)) * m_ne[None]
    p["be"] = lin(ks[3], node_feat, (1, NUM_EDGES))
    # HNN edges->triangles, masked
    p["wet"] = lin(ks[4], NUM_EDGES, (NUM_EDGES, NUM_TRIANGLES)) * m_et
    p["bt"] = lin(ks[5], NUM_EDGES, (1, NUM_TRIANGLES))
    # HNN triangles->tetrahedra, masked
    p["wtt"] = lin(ks[6], NUM_TRIANGLES, (NUM_TRIANGLES, NUM_TETRAHEDRA)) * m_tt
    p["btt"] = lin(ks[7], NUM_TRIANGLES, (1, NUM_TETRAHEDRA))
    # Readout Linear(E + T + K -> classes), split along the concat axis.
    fan = NUM_EDGES + NUM_TRIANGLES + NUM_TETRAHEDRA
    p["wre"] = lin(ks[8], fan, (NUM_EDGES, NUM_CLASSES))
    p["wrt"] = lin(ks[9], fan, (NUM_TRIANGLES, NUM_CLASSES))
    p["wrk"] = lin(ks[10], fan, (NUM_TETRAHEDRA, NUM_CLASSES))
    p["br"] = lin(ks[11], fan, (1, NUM_CLASSES))
    return p


# ----------------------------------------------------------------------------
# Parameter packing: one zero-padded (544, 128) bf16 slab, built once.
# ----------------------------------------------------------------------------
def pack_params(p):
    nc = NUM_NODES * NUM_CHANNELS
    assert SEQ_LEN <= FEAT and nc <= FEAT
    assert NUM_EDGES + NUM_TRIANGLES + NUM_TETRAHEDRA <= FEAT and NUM_CLASSES <= FEAT

    def pad_block(w, rows, row_off=0, col_off=0):
        m = jnp.zeros((rows, FEAT), jnp.float32)
        return m.at[row_off:row_off + w.shape[0],
                    col_off:col_off + w.shape[1]].set(w.astype(jnp.float32))

    def pad_row(v, off=0):
        r = jnp.zeros((FEAT,), jnp.float32)
        return r.at[off:off + v.shape[0]].set(v.astype(jnp.float32))

    # Conv1d(k=2, s=2) as an exact block-diagonal matmul on the raw sequence:
    #   Wconv[2n + k, n*C + c] = wc[k, c]   (output features in n*C + c order,
    #   matching permute(0,2,1).flatten and the channel-expanded connectivity).
    wconv = jnp.kron(jnp.eye(NUM_NODES, dtype=jnp.float32), p["wc"])   # (2N, N*C)
    bconv = jnp.tile(p["bc"], NUM_NODES)                               # (N*C,)
    # Channel-expanded nodes->edges weight, flattened to (N*C, E).
    wne_flat = jnp.transpose(p["wne"], (1, 0, 2)).reshape(nc, NUM_EDGES)
    # Fused readout: rows 0..E-1 = edges part, E..E+T-1 = tri part, rest = tet.
    wr = jnp.concatenate([p["wre"], p["wrt"], p["wrk"]], axis=0)       # (E+T+K, classes)

    bias_rows = [
        pad_row(bconv),                    # row 0: conv bias (n*C+c order)
        pad_row(p["be"][0]),               # row 1: edge bias,  lanes [0, E)
        pad_row(p["bt"][0], TRI_LANE),     # row 2: tri bias,   lanes [12, 18)
        pad_row(p["btt"][0], TET_LANE),    # row 3: tet bias,   lanes [18, 20)
        pad_row(p["br"][0]),               # row 4: readout bias
    ] + [jnp.zeros((FEAT,), jnp.float32)] * (_BIAS_ROWS - 5)
    bias_block = jnp.stack(bias_rows, axis=0)                          # (16, 128)

    slab = jnp.concatenate([
        bias_block,
        pad_block(wconv, SEQ_LEN),                       # conv weight (16 rows)
        pad_block(wne_flat, FEAT),                       # nodes->edges, out lanes 0..11
        pad_block(p["wet"], FEAT, 0, TRI_LANE),          # edges->tri,   out lanes 12..17
        pad_block(p["wtt"], FEAT, TRI_LANE, TET_LANE),   # tri->tet, in 12..17, out 18..19
        pad_block(wr, FEAT),                             # fused readout, in lanes 0..19
    ], axis=0)
    assert slab.shape == (SLAB_ROWS, FEAT)
    return slab.astype(jnp.bfloat16)


# ----------------------------------------------------------------------------
# Pallas kernel: conv-as-matmul + masked HNN + fused readout, 5 bf16 MXU passes
# ----------------------------------------------------------------------------
def hcnn_kernel(x_ref, slab_ref, out_ref):
    # x_ref:    (TB, SEQ_LEN) f32 raw conv input (no lane padding)
    # slab_ref: (SLAB_ROWS, 128) bf16 packed parameters (zero-padded segments)
    # out_ref:  (TB, 128) bf16, logits in lanes [0, NUM_CLASSES), zero elsewhere
    biases = slab_ref[0:_BIAS_ROWS, :].astype(jnp.float32)   # (16, 128)
    b_conv = biases[0:1, :]
    b_edge = biases[1:2, :]
    b_tri = biases[2:3, :]
    b_tet = biases[3:4, :]
    b_out = biases[4:5, :]

    def mm(a, row, rows=FEAT):
        # Static, 16-row-aligned bf16 weight slice -> one native-bf16 MXU pass,
        # f32 accumulation.
        return jnp.dot(a.astype(jnp.bfloat16), slab_ref[row:row + rows, :],
                       preferred_element_type=jnp.float32)

    x = x_ref[...]
    # Conv1d(kernel=2, stride=2) + ReLU as one block-structured matmul; output
    # feature n*C + c is exactly channel c of conv position n.
    h = jnp.maximum(mm(x, ROW_WCONV, SEQ_LEN) + b_conv, 0.0)
    # Masked HNN message passing; tri / tet land in disjoint lane ranges.
    edges = jnp.maximum(mm(h, ROW_WNE) + b_edge, 0.0)        # lanes [0, 12)
    tri = jnp.maximum(mm(edges, ROW_WET) + b_tri, 0.0)       # lanes [12, 18)
    tet = jnp.maximum(mm(tri, ROW_WTT) + b_tet, 0.0)         # lanes [18, 20)
    # Readout over concat([edges, tri, tet]): disjoint lanes -> 2 VPU adds + 1 dot.
    logits = mm(edges + tri + tet, ROW_WR) + b_out
    out_ref[...] = logits.astype(out_ref.dtype)


def convoluted_mixing_hnn_forward(x, slab):
    """x: (B, 1, L) float32, PyTorch Conv1d NCL layout."""
    b, in_ch, seq = x.shape
    assert in_ch == 1 and seq == SEQ_LEN

    # Adaptive batch tiling: tiles up to 1024 rows (amortize ~0.35us/step), at
    # least 2 grid steps whenever B allows so v7x's two TensorCores both get
    # work, and <16 rows of tail waste per step.  16-row multiples keep the
    # bf16 output block sublane-aligned.
    b_pad0 = max(_round_up(b, 16), 16)
    if b_pad0 <= 16:
        n_steps, tb = 1, 16
    else:
        n_steps = max(2, _cdiv(b_pad0, 1024))
        tb = _round_up(_cdiv(b_pad0, n_steps), 16)
    b_pad = n_steps * tb

    # Layout plumbing only: NCL -> (B, L) and zero-pad batch rows.  No lane
    # padding of x (16 real lanes), so input HBM traffic is 64 B/sample.
    x_flat = jnp.zeros((b_pad, SEQ_LEN), jnp.float32)
    x_flat = x_flat.at[:b, :].set(x[:, 0, :].astype(jnp.float32))

    out = pl.pallas_call(
        hcnn_kernel,
        out_shape=jax.ShapeDtypeStruct((b_pad, FEAT), jnp.bfloat16),
        grid=(n_steps,),
        in_specs=[
            pl.BlockSpec((tb, SEQ_LEN), lambda i: (i, 0)),        # activations
            # Constant index_map -> the pipeline fetches the slab exactly once
            # and keeps it resident across the whole grid.
            pl.BlockSpec((SLAB_ROWS, FEAT), lambda i: (0, 0)),    # weights
        ],
        out_specs=pl.BlockSpec((tb, FEAT), lambda i: (i, 0)),
        compiler_params=pltpu.CompilerParams(
            dimension_semantics=("parallel",)),
    )(x_flat, slab)
    return out[:b, :NUM_CLASSES].astype(jnp.float32)


# ----------------------------------------------------------------------------
# Pure-JAX f32 reference (same math as the original module) for validation.
# ----------------------------------------------------------------------------
def reference_forward(x, p):
    b = x.shape[0]
    x2 = x.reshape(b, NUM_NODES, 2)
    xe, xo = x2[:, :, 0], x2[:, :, 1]
    edges = jnp.zeros((b, NUM_EDGES), jnp.float32)
    for c in range(NUM_CHANNELS):
        h_c = jnp.maximum(xe * p["wc"][0, c] + xo * p["wc"][1, c] + p["bc"][c], 0.0)
        edges = edges + h_c @ p["wne"][c]
    edges = jnp.maximum(edges + p["be"], 0.0)
    tri = jnp.maximum(edges @ p["wet"] + p["bt"], 0.0)
    tet = jnp.maximum(tri @ p["wtt"] + p["btt"], 0.0)
    return edges @ p["wre"] + tri @ p["wrt"] + tet @ p["wrk"] + p["br"]


if __name__ == "__main__":
    key = jax.random.PRNGKey(0)
    k_param, k_x = jax.random.split(key)
    params = init_params(k_param)
    slab = pack_params(params)

    # Kernel runs in bf16 (weights + matmul inputs) with f32 accumulation; the
    # reference is pure f32, so tolerances are loosened accordingly.  Structural
    # errors (wrong lane offsets, transposed weights, ...) would be O(1).
    TOL = 5e-2

    # Small latency-regime batch (single grid step).
    x_small = jax.random.normal(k_x, (BATCH, 1, SEQ_LEN), jnp.float32)
    out_small = jax.block_until_ready(convoluted_mixing_hnn_forward(x_small, slab))
    assert out_small.shape == (BATCH, NUM_CLASSES)
    assert jnp.all(jnp.isfinite(out_small))
    np.testing.assert_allclose(np.asarray(out_small),
                               np.asarray(reference_forward(x_small, params)),
                               rtol=TOL, atol=TOL)

    # Larger batch exercising the multi-step "parallel" grid (2 tiles).
    x_big = jax.random.normal(jax.random.PRNGKey(1), (40, 1, SEQ_LEN), jnp.float32)
    out_big = jax.block_until_ready(convoluted_mixing_hnn_forward(x_big, slab))
    assert out_big.shape == (40, NUM_CLASSES)
    assert jnp.all(jnp.isfinite(out_big))
    np.testing.assert_allclose(np.asarray(out_big),
                               np.asarray(reference_forward(x_big, params)),
                               rtol=TOL, atol=TOL)

    print("KERNEL_OK")
</pallas_src>

<mosaic_0001>
module attributes {stable_mosaic.version = 11 : i64} {
  func.func @hcnn_kernel(%arg0: i32, %arg1: memref<16x16xf32, #tpu.memory_space<vmem>>, %arg2: memref<544x128xbf16, #tpu.memory_space<vmem>>, %arg3: memref<16x128xbf16, #tpu.memory_space<vmem>>) attributes {dimension_semantics = [#tpu.dimension_semantics<parallel>], iteration_bounds = array<i64: 1>, scalar_prefetch = 0 : i64, scratch_operands = 0 : i64, tpu.core_type = #tpu.core_type<tc>, window_params = [{transform_indices = @transform_0, window_bounds = array<i64: 16, 16>}, {pipeline_mode = #tpu.pipeline_mode<synchronous>, transform_indices = @transform_1, window_bounds = array<i64: 544, 128>}, {transform_indices = @transform_2, window_bounds = array<i64: 16, 128>}]} {
    %c0 = arith.constant 0 : index
    %c0_0 = arith.constant 0 : index
    %0 = vector.load %arg2[%c0, %c0_0] : memref<544x128xbf16, #tpu.memory_space<vmem>>, vector<16x128xbf16>
    %1 = arith.extf %0 : vector<16x128xbf16> to vector<16x128xf32>
    %2 = vector.extract_strided_slice %1 {offsets = [0, 0], sizes = [1, 128], strides = [1, 1]} : vector<16x128xf32> to vector<1x128xf32>
    %3 = vector.extract_strided_slice %1 {offsets = [1, 0], sizes = [1, 128], strides = [1, 1]} : vector<16x128xf32> to vector<1x128xf32>
    %4 = vector.extract_strided_slice %1 {offsets = [2, 0], sizes = [1, 128], strides = [1, 1]} : vector<16x128xf32> to vector<1x128xf32>
    %5 = vector.extract_strided_slice %1 {offsets = [3, 0], sizes = [1, 128], strides = [1, 1]} : vector<16x128xf32> to vector<1x128xf32>
    %6 = vector.extract_strided_slice %1 {offsets = [4, 0], sizes = [1, 128], strides = [1, 1]} : vector<16x128xf32> to vector<1x128xf32>
    %c0_1 = arith.constant 0 : index
    %c0_2 = arith.constant 0 : index
    %7 = vector.load %arg1[%c0_1, %c0_2] : memref<16x16xf32, #tpu.memory_space<vmem>>, vector<16x16xf32>
    %8 = arith.truncf %7 : vector<16x16xf32> to vector<16x16xbf16>
    %c16 = arith.constant 16 : index
    %c0_3 = arith.constant 0 : index
    %9 = vector.load %arg2[%c16, %c0_3] : memref<544x128xbf16, #tpu.memory_space<vmem>>, vector<16x128xbf16>
    %cst = arith.constant dense<0.000000e+00> : vector<16x128xf32>
    %10 = tpu.matmul %8, %9, %cst {dimension_numbers = #tpu.dot_dimension_numbers<[1], [0], [0], [1], [0, 0, 1, 1], [], []>} : vector<16x16xbf16>, vector<16x128xbf16>, vector<16x128xf32> -> vector<16x128xf32>
    %11 = vector.broadcast %2 : vector<1x128xf32> to vector<16x128xf32>
    %12 = arith.addf %10, %11 : vector<16x128xf32>
    %cst_4 = arith.constant 0.000000e+00 : f32
    %13 = vector.broadcast %cst_4 : f32 to vector<16x128xf32>
    %14 = arith.maximumf %12, %13 : vector<16x128xf32>
    %15 = arith.truncf %14 : vector<16x128xf32> to vector<16x128xbf16>
    %c32 = arith.constant 32 : index
    %c0_5 = arith.constant 0 : index
    %16 = vector.load %arg2[%c32, %c0_5] : memref<544x128xbf16, #tpu.memory_space<vmem>>, vector<128x128xbf16>
    %cst_6 = arith.constant dense<0.000000e+00> : vector<16x128xf32>
    %17 = tpu.matmul %15, %16, %cst_6 {dimension_numbers = #tpu.dot_dimension_numbers<[1], [0], [0], [1], [0, 0, 1, 1], [], []>} : vector<16x128xbf16>, vector<128x128xbf16>, vector<16x128xf32> -> vector<16x128xf32>
    %18 = vector.broadcast %3 : vector<1x128xf32> to vector<16x128xf32>
    %19 = arith.addf %17, %18 : vector<16x128xf32>
    %cst_7 = arith.constant 0.000000e+00 : f32
    %20 = vector.broadcast %cst_7 : f32 to vector<16x128xf32>
    %21 = arith.maximumf %19, %20 : vector<16x128xf32>
    %22 = arith.truncf %21 : vector<16x128xf32> to vector<16x128xbf16>
    %c160 = arith.constant 160 : index
    %c0_8 = arith.constant 0 : index
    %23 = vector.load %arg2[%c160, %c0_8] : memref<544x128xbf16, #tpu.memory_space<vmem>>, vector<128x128xbf16>
    %cst_9 = arith.constant dense<0.000000e+00> : vector<16x128xf32>
    %24 = tpu.matmul %22, %23, %cst_9 {dimension_numbers = #tpu.dot_dimension_numbers<[1], [0], [0], [1], [0, 0, 1, 1], [], []>} : vector<16x128xbf16>, vector<128x128xbf16>, vector<16x128xf32> -> vector<16x128xf32>
    %25 = vector.broadcast %4 : vector<1x128xf32> to vector<16x128xf32>
    %26 = arith.addf %24, %25 : vector<16x128xf32>
    %cst_10 = arith.constant 0.000000e+00 : f32
    %27 = vector.broadcast %cst_10 : f32 to vector<16x128xf32>
    %28 = arith.maximumf %26, %27 : vector<16x128xf32>
    %29 = arith.truncf %28 : vector<16x128xf32> to vector<16x128xbf16>
    %c288 = arith.constant 288 : index
    %c0_11 = arith.constant 0 : index
    %30 = vector.load %arg2[%c288, %c0_11] : memref<544x128xbf16, #tpu.memory_space<vmem>>, vector<128x128xbf16>
    %cst_12 = arith.constant dense<0.000000e+00> : vector<16x128xf32>
    %31 = tpu.matmul %29, %30, %cst_12 {dimension_numbers = #tpu.dot_dimension_numbers<[1], [0], [0], [1], [0, 0, 1, 1], [], []>} : vector<16x128xbf16>, vector<128x128xbf16>, vector<16x128xf32> -> vector<16x128xf32>
    %32 = vector.broadcast %5 : vector<1x128xf32> to vector<16x128xf32>
    %33 = arith.addf %31, %32 : vector<16x128xf32>
    %cst_13 = arith.constant 0.000000e+00 : f32
    %34 = vector.broadcast %cst_13 : f32 to vector<16x128xf32>
    %35 = arith.maximumf %33, %34 : vector<16x128xf32>
    %36 = arith.addf %21, %28 : vector<16x128xf32>
    %37 = arith.addf %36, %35 : vector<16x128xf32>
    %38 = arith.truncf %37 : vector<16x128xf32> to vector<16x128xbf16>
    %c416 = arith.constant 416 : index
    %c0_14 = arith.constant 0 : index
    %39 = vector.load %arg2[%c416, %c0_14] : memref<544x128xbf16, #tpu.memory_space<vmem>>, vector<128x128xbf16>
    %cst_15 = arith.constant dense<0.000000e+00> : vector<16x128xf32>
    %40 = tpu.matmul %38, %39, %cst_15 {dimension_numbers = #tpu.dot_dimension_numbers<[1], [0], [0], [1], [0, 0, 1, 1], [], []>} : vector<16x128xbf16>, vector<128x128xbf16>, vector<16x128xf32> -> vector<16x128xf32>
    %41 = vector.broadcast %6 : vector<1x128xf32> to vector<16x128xf32>
    %42 = arith.addf %40, %41 : vector<16x128xf32>
    %43 = arith.truncf %42 : vector<16x128xf32> to vector<16x128xbf16>
    %c0_16 = arith.constant 0 : index
    %c0_17 = arith.constant 0 : index
    %44 = vector.load %arg3[%c0_16, %c0_17] : memref<16x128xbf16, #tpu.memory_space<vmem>>, vector<16x128xbf16>
    tpu.vector_store %arg3[%c0_16, %c0_17], %43 {strides = array<i32>} : memref<16x128xbf16, #tpu.memory_space<vmem>>, vector<16x128xbf16>,
    return
  }
  func.func @transform_0(%arg0: i32) -> (i32, i32) {
    %c0_i32 = arith.constant 0 : i32
    %c0_i32_0 = arith.constant 0 : i32
    return %arg0, %c0_i32 : i32, i32
  }
  func.func @transform_1(%arg0: i32) -> (i32, i32) {
    %c0_i32 = arith.constant 0 : i32
    %c0_i32_0 = arith.constant 0 : i32
    %c0_i32_1 = arith.constant 0 : i32
    return %c0_i32, %c0_i32_0 : i32, i32
  }
  func.func @transform_2(%arg0: i32) -> (i32, i32) {
    %c0_i32 = arith.constant 0 : i32
    %c0_i32_0 = arith.constant 0 : i32
    return %arg0, %c0_i32 : i32, i32
  }
}

</mosaic_0001>

<bundles_post_ra>
// kernel: tpu_custom_call.1
= control target key start
LH: loop header
LB: loop body
LE: loop exit
PB: predicated region body
PF: predicated region fallthrough
CT: control target
= control target key end

     0   :  { %7 = vsyncpa [#allocation3], 0  ;;  %s954_s0 = inlined_call_operand.hbm [shape: f32[16,16], index: 0, kind: input, shape index: {}]   ;;  %s955_s1 = inlined_call_operand.hbm [shape: bf16[544,128], index: 1, kind: input, shape index: {}]   ;;  %s956_s2 = inlined_call_operand.hbm [shape: bf16[16,128], index: 2, kind: output, shape index: {}]  }
   0x1   :  { %8 = vsyncpa [#allocation6], 0 }
   0x2   :  { %9 = vsyncpa [#allocation4], 0  ;;  %s858_s9 = smov [#allocation2]  }
   0x3   :  { %s15_s10 = sshll.u32 %s858_s9, 4  ;;  %s16_s10 = int_to_ptr.vmem [resolvable:$true] %s15_s10 }
   0x4   :  { %s800_s11 = scalar_lea.vmem %s16_s10, 256  ;;  %p805_p1 = scmp.lt.s32.totalorder %s16_s10, %s16_s10 }
   0x5   :  { %p801_p0 = scmp.ne.s32.totalorder %s16_s10, %s800_s11  ;;  %p806_p2 = scmp.lt.s32.totalorder %s800_s11, %s800_s11 }
   0x7   :  { %p807_p3 = por %p806_p2, %p805_p1 }
   0x9   :  { %p808_p4 = pnand %p807_p3, %p801_p0 }
   0xb   :  { %811 = shalt.err (!%p808_p4)
}
   0xc   :  { %s859_s12 = smov 128   ;;  %s860_s13 = smov 8  }
   0xd   :  { %21 = dma.hbm_to_vmem [thread:$0]  %s954_s0, 256, %s16_s10, [#allocation3], %s859_s12, %s859_s12, %s860_s13  }
   0xe   :  { %s861_s16 = smov [#allocation5]  }
   0xf   :  { %s27_s17 = sshll.u32 %s861_s16, 4  ;;  %s28_s17 = int_to_ptr.vmem [resolvable:$true] %s27_s17 }
  0x10   :  { %s820_s18 = scalar_lea.vmem %s28_s17, 4352  ;;  %p825_p6 = scmp.lt.s32.totalorder %s28_s17, %s28_s17 }
  0x11   :  { %p821_p5 = scmp.ne.s32.totalorder %s28_s17, %s820_s18  ;;  %p826_p7 = scmp.lt.s32.totalorder %s820_s18, %s820_s18 }
  0x13   :  { %p827_p8 = por %p826_p7, %p825_p6 }
  0x15   :  { %p828_p9 = pnand %p827_p8, %p821_p5 }
  0x17   :  { %831 = shalt.err (!%p828_p9)
}
  0x18   :  { %s862_s19 = smov 64   ;;  %s863_s20 = smov 4  }
  0x19   :  { %33 = dma.hbm_to_vmem [thread:$0]  %s955_s1, 4352, %s28_s17, [#allocation6], %s862_s19, %s862_s19, %s863_s20  }
  0x1a   :  { %852 = dma.done.wait [#allocation3], 256  }
  0x1b   :  { %853 = vsyncadd [#allocation3], 4294967040 }
  0x1c   :  { %854 = dma.done.wait [#allocation6], 4352  }
  0x1d   :  { %855 = vsyncadd [#allocation6], 4294962944  ;;  %v864_v0 = vmov 0.0   ;;  %vm865_vm0 = vmmov 0   ;;  %v759_v1 = vld [vmem:[#allocation5 + $0x8] sm:$0xff]   ;;  %v43_v2 = vld [vmem:[#allocation2] sm:$0xff]  ;;  %v48_v18 = vlaneseq }
  0x1e   :  { %664 = vmatprep.subr.bf16.mxu0 %v864_v0  ;;  %666 = vmatprep.mubr.msk.bf16.mxu0 %vm865_vm0, %v864_v0  ;;  %v44_v3 = vld [vmem:[#allocation2 + $0x8] sm:$0xff]  ;;  %vm58_vm1 = vcmask 130048   ;;  %v760_v5 = vld [vmem:[#allocation5 + $0x48] sm:$0xff]   ;;  %v761_v6 = vld [vmem:[#allocation5 + $0x40] sm:$0xff]   ;;  %s866_s0 = smov [#allocation7]  }
  0x1f   :  { %670 = vmatprep.subr.bf16.mxu1 %v864_v0  ;;  %686 = vmatprep.mubr.msk.bf16.mxu1 %vm865_vm0, %v864_v0  ;;  %v45_v4 = vpack.c.bf16 %v44_v3, %v43_v2  ;;  %v762_v7 = vld [vmem:[#allocation5 + $0x38] sm:$0xff]   ;;  %v763_v8 = vld [vmem:[#allocation5 + $0x30] sm:$0xff]   ;;  %v764_v9 = vld [vmem:[#allocation5 + $0x28] sm:$0xff]   ;;  %v913_v19 = vshrl.u32 %v48_v18, 7  ;;  %s570_s1 = sshll.u32 %s866_s0, 4  ;;  %s571_s1 = int_to_ptr.vmem [resolvable:$true] %s570_s1 }
  0x20   :  { %665 = vmatpush3.bf16.msra.mxu0 %v759_v1  ;;  %671 = vmatpush3.bf16.msra.mxu1 %v760_v5  ;;  %v765_v10 = vld [vmem:[#allocation5 + $0x20] sm:$0xff]   ;;  %v766_v11 = vld [vmem:[#allocation5 + $0x18] sm:$0xff]   ;;  %v767_v12 = vld [vmem:[#allocation5 + $0x10] sm:$0xff]   ;;  %s832_s23 = scalar_lea.vmem %s571_s1, 128  ;;  %p837_p11 = scmp.lt.s32.totalorder %s571_s1, %s571_s1 }
  0x21   :  { %690 = vmatprep.subr.bf16.mxu0 %v864_v0  ;;  %672 = vmatprep.subr.bf16.mxu1 %v864_v0  ;;  %v768_v13 = vld [vmem:[#allocation5 + $0x88] sm:$0xff]   ;;  %v769_v14 = vld [vmem:[#allocation5 + $0x80] sm:$0xff]   ;;  %v770_v15 = vld [vmem:[#allocation5 + $0x78] sm:$0xff]   ;;  %v50_v22 = vsub.s32 0, %v913_v19  ;;  %v124_v41 = vsub.s32 1, %v913_v19  ;;  %v236_v60 = vsub.s32 2, %v913_v19  ;;  %p833_p10 = scmp.ne.s32.totalorder %s571_s1, %s832_s23  ;;  %p838_p12 = scmp.lt.s32.totalorder %s832_s23, %s832_s23 }
  0x22   :  { %v771_v16 = vld [vmem:[#allocation5 + $0x70] sm:$0xff]   ;;  %v772_v17 = vld [vmem:[#allocation5 + $0x68] sm:$0xff]   ;;  %v41_v20 = vld [vmem:[#allocation5] sm:$0xf] }
  0x23   :  { %667 = vmatmul.mubr.msk.bf16.vlgmr.msra.gmra.mxu0 %vm58_vm1, %v45_v4  ;;  %v915_v21 = vunpack.c.l.bf16 %v41_v20  ;;  %v773_v33 = vld [vmem:[#allocation5 + $0x60] sm:$0xff]   ;;  %v774_v34 = vld [vmem:[#allocation5 + $0x58] sm:$0xff]   ;;  %v775_v35 = vld [vmem:[#allocation5 + $0x50] sm:$0xff]   ;;  %p839_p13 = por %p838_p12, %p837_p11 }
  0x24   :  { %706 = vmatprep.mubr.msk.bf16.mxu0 %vm865_vm0, %v864_v0  ;;  %673 = vmatpush3.bf16.msra.mxu1 %v761_v6  ;;  %v776_v36 = vld [vmem:[#allocation5 + $0xc8] sm:$0xff]   ;;  %v777_v37 = vld [vmem:[#allocation5 + $0xc0] sm:$0xff]   ;;  %v778_v38 = vld [vmem:[#allocation5 + $0xb8] sm:$0xff]  }
  0x25   :  { %674 = vmatprep.subr.bf16.mxu1 %v864_v0  ;;  %691 = vmatpush3.bf16.msra.mxu0 %v768_v13  ;;  %v51_v23 = vrot.slane %v915_v21, %v50_v22  ;;  %v779_v39 = vld [vmem:[#allocation5 + $0xb0] sm:$0xff]   ;;  %v780_v40 = vld [vmem:[#allocation5 + $0xa8] sm:$0xff]   ;;  %v125_v42 = vrot.slane %v915_v21, %v124_v41  ;;  %v781_v52 = vld [vmem:[#allocation5 + $0xa0] sm:$0xff]   ;;  %v237_v61 = vrot.slane %v915_v21, %v236_v60  ;;  %p840_p0 = pnand %p839_p13, %p833_p10 }
  0x26   :  { %692 = vmatprep.subr.bf16.mxu0 %v864_v0  ;;  %v782_v53 = vld [vmem:[#allocation5 + $0x98] sm:$0xff]   ;;  %v783_v54 = vld [vmem:[#allocation5 + $0x90] sm:$0xff]   ;;  %v784_v55 = vld [vmem:[#allocation5 + $0x108] sm:$0xff]  }
  0x27   :  { %v785_v56 = vld [vmem:[#allocation5 + $0x100] sm:$0xff]   ;;  %v786_v57 = vld [vmem:[#allocation5 + $0xf8] sm:$0xff]   ;;  %v787_v58 = vld [vmem:[#allocation5 + $0xf0] sm:$0xff]  }
  0x28   :  { %675 = vmatpush3.bf16.msra.mxu1 %v762_v7  ;;  %v788_v59 = vld [vmem:[#allocation5 + $0xe8] sm:$0xff]  }
  0x29   :  { %676 = vmatprep.subr.bf16.mxu1 %v864_v0  ;;  %693 = vmatpush3.bf16.msra.mxu0 %v769_v14 }
  0x2a   :  { %694 = vmatprep.subr.bf16.mxu0 %v864_v0 }
  0x2c   :  { %677 = vmatpush3.bf16.msra.mxu1 %v763_v8  ;;  %v789_v8 = vld [vmem:[#allocation5 + $0xe0] sm:$0xff]  }
  0x2d   :  { %678 = vmatprep.subr.bf16.mxu1 %v864_v0  ;;  %695 = vmatpush3.bf16.msra.mxu0 %v770_v15 }
  0x2e   :  { %696 = vmatprep.subr.bf16.mxu0 %v864_v0 }
  0x30   :  { %679 = vmatpush3.bf16.msra.mxu1 %v764_v9  ;;  %v790_v9 = vld [vmem:[#allocation5 + $0xd8] sm:$0xff]  }
  0x31   :  { %680 = vmatprep.subr.bf16.mxu1 %v864_v0  ;;  %697 = vmatpush3.bf16.msra.mxu0 %v771_v16 }
  0x32   :  { %698 = vmatprep.subr.bf16.mxu0 %v864_v0 }
  0x34   :  { %681 = vmatpush3.bf16.msra.mxu1 %v765_v10  ;;  %v791_v10 = vld [vmem:[#allocation5 + $0xd0] sm:$0xff]  }
  0x35   :  { %682 = vmatprep.subr.bf16.mxu1 %v864_v0  ;;  %699 = vmatpush3.bf16.msra.mxu0 %v772_v17 }
  0x36   :  { %700 = vmatprep.subr.bf16.mxu0 %v864_v0 }
  0x38   :  { %683 = vmatpush3.bf16.msra.mxu1 %v766_v11  ;;  %v348_v11 = vsub.s32 3, %v913_v19 }
  0x39   :  { %684 = vmatprep.subr.bf16.mxu1 %v864_v0  ;;  %701 = vmatpush3.bf16.msra.mxu0 %v773_v33 }
  0x3a   :  { %702 = vmatprep.subr.bf16.mxu0 %v864_v0 }
  0x3c   :  { %685 = vmatpush3.bf16.msra.mxu1 %v767_v12  ;;  %v349_v12 = vrot.slane %v915_v21, %v348_v11 }
  0x3d   :  { %710 = vmatprep.subr.bf16.mxu1 %v864_v0  ;;  %703 = vmatpush3.bf16.msra.mxu0 %v774_v34 }
  0x3e   :  { %704 = vmatprep.subr.bf16.mxu0 %v864_v0 }
  0x41   :  { %705 = vmatpush3.bf16.msra.mxu0 %v775_v35 }
  0x42   :  { %730 = vmatprep.subr.bf16.mxu0 %v864_v0 }
  0xe3   :  { %v96_v24 = vpop.f32.mrf.mxu0 }
  0xe4   :  { %v97_v26 = vadd.f32 %v96_v24, %v51_v23 }
  0xe5   :  { %v668_v25 = vpop.f32.mrf.mxu0 }
  0xe6   :  { %v103_v30 = vmax.f32 %v97_v26, 0.0 }
  0xe7   :  { %v99_v27 = vpop.f32.mrf.mxu0 }
  0xe8   :  { %v100_v28 = vadd.f32 %v99_v27, %v51_v23 }
  0xe9   :  { %v669_v29 = vpop.f32.mrf.mxu0 }
  0xea   :  { %v104_v31 = vmax.f32 %v100_v28, 0.0 }
  0xec   :  { %v105_v32 = vpack.c.bf16 %v104_v31, %v103_v30 }
  0xee   :  { %687 = vmatmul.mubr.bf16.vlgmr.msra.gmra.mxu1 %v105_v32 }
  0xef   :  { %726 = vmatprep.mubr.msk.bf16.mxu1 %vm865_vm0, %v864_v0  ;;  %711 = vmatpush3.bf16.msra.mxu1 %v776_v36 }
  0xf0   :  { %712 = vmatprep.subr.bf16.mxu1 %v864_v0 }
  0xf3   :  { %713 = vmatpush3.bf16.msra.mxu1 %v777_v37 }
  0xf4   :  { %714 = vmatprep.subr.bf16.mxu1 %v864_v0 }
  0xf7   :  { %715 = vmatpush3.bf16.msra.mxu1 %v778_v38 }
  0xf8   :  { %716 = vmatprep.subr.bf16.mxu1 %v864_v0 }
  0xfb   :  { %717 = vmatpush3.bf16.msra.mxu1 %v779_v39 }
  0xfc   :  { %718 = vmatprep.subr.bf16.mxu1 %v864_v0 }
  0xff   :  { %719 = vmatpush3.bf16.msra.mxu1 %v780_v40 }
 0x100   :  { %720 = vmatprep.subr.bf16.mxu1 %v864_v0 }
 0x103   :  { %721 = vmatpush3.bf16.msra.mxu1 %v781_v52 }
 0x104   :  { %722 = vmatprep.subr.bf16.mxu1 %v864_v0 }
 0x107   :  { %723 = vmatpush3.bf16.msra.mxu1 %v782_v53 }
 0x108   :  { %724 = vmatprep.subr.bf16.mxu1 %v864_v0 }
 0x10b   :  { %725 = vmatpush3.bf16.msra.mxu1 %v783_v54 }
 0x1ae   :  { %v208_v43 = vpop.f32.mrf.mxu1 }
 0x1af   :  { %v209_v45 = vadd.f32 %v208_v43, %v125_v42 }
 0x1b0   :  { %v688_v44 = vpop.f32.mrf.mxu1 }
 0x1b1   :  { %v215_v49 = vmax.f32 %v209_v45, 0.0 }
 0x1b2   :  { %v211_v46 = vpop.f32.mrf.mxu1 }
 0x1b3   :  { %v212_v47 = vadd.f32 %v211_v46, %v125_v42 }
 0x1b4   :  { %v689_v48 = vpop.f32.mrf.mxu1 }
 0x1b5   :  { %v216_v50 = vmax.f32 %v212_v47, 0.0 }
 0x1b7   :  { %v217_v51 = vpack.c.bf16 %v216_v50, %v215_v49 }
 0x1b9   :  { %707 = vmatmul.mubr.bf16.vlgmr.msra.gmra.mxu0 %v217_v51 }
 0x1ba   :  { %746 = vmatprep.mubr.msk.bf16.mxu0 %vm865_vm0, %v864_v0  ;;  %731 = vmatpush3.bf16.msra.mxu0 %v784_v55 }
 0x1bb   :  { %732 = vmatprep.subr.bf16.mxu0 %v864_v0 }
 0x1be   :  { %733 = vmatpush3.bf16.msra.mxu0 %v785_v56 }
 0x1bf   :  { %734 = vmatprep.subr.bf16.mxu0 %v864_v0 }
 0x1c2   :  { %735 = vmatpush3.bf16.msra.mxu0 %v786_v57 }
 0x1c3   :  { %736 = vmatprep.subr.bf16.mxu0 %v864_v0 }
 0x1c6   :  { %737 = vmatpush3.bf16.msra.mxu0 %v787_v58 }
 0x1c7   :  { %738 = vmatprep.subr.bf16.mxu0 %v864_v0 }
 0x1ca   :  { %739 = vmatpush3.bf16.msra.mxu0 %v788_v59 }
 0x1cb   :  { %740 = vmatprep.subr.bf16.mxu0 %v864_v0 }
 0x1ce   :  { %741 = vmatpush3.bf16.msra.mxu0 %v789_v8 }
 0x1cf   :  { %742 = vmatprep.subr.bf16.mxu0 %v864_v0 }
 0x1d2   :  { %743 = vmatpush3.bf16.msra.mxu0 %v790_v9 }
 0x1d3   :  { %744 = vmatprep.subr.bf16.mxu0 %v864_v0  ;;  %v464_v0 = vsub.s32 4, %v913_v19 }
 0x1d5   :  { %v465_v29 = vrot.slane %v915_v21, %v464_v0 }
 0x1d6   :  { %745 = vmatpush3.bf16.msra.mxu0 %v791_v10 }
 0x279   :  { %v320_v62 = vpop.f32.mrf.mxu0 }
 0x27a   :  { %v321_v1 = vadd.f32 %v320_v62, %v237_v61 }
 0x27b   :  { %v708_v63 = vpop.f32.mrf.mxu0 }
 0x27c   :  { %v327_v5 = vmax.f32 %v321_v1, 0.0 }
 0x27d   :  { %v323_v2 = vpop.f32.mrf.mxu0 }
 0x27e   :  { %v324_v3 = vadd.f32 %v323_v2, %v237_v61  ;;  %v441_v22 = vadd.f32 %v327_v5, %v215_v49 }
 0x27f   :  { %v709_v4 = vpop.f32.mrf.mxu0 }
 0x280   :  { %v328_v6 = vmax.f32 %v324_v3, 0.0 }
 0x282   :  { %v329_v7 = vpack.c.bf16 %v328_v6, %v327_v5  ;;  %v442_v23 = vadd.f32 %v328_v6, %v216_v50 }
 0x284   :  { %727 = vmatmul.mubr.bf16.vlgmr.msra.gmra.mxu1 %v329_v7 }
 0x344   :  { %v432_v13 = vpop.f32.mrf.mxu1 }
 0x345   :  { %v433_v14 = vadd.f32 %v432_v13, %v349_v12 }
 0x346   :  { %v728_v15 = vpop.f32.mrf.mxu1 }
 0x347   :  { %v439_v17 = vmax.f32 %v433_v14, 0.0 }
 0x348   :  { %v435_v16 = vpop.f32.mrf.mxu1 }
 0x349   :  { %v436_v18 = vadd.f32 %v435_v16, %v349_v12  ;;  %v443_v25 = vadd.f32 %v441_v22, %v439_v17 }
 0x34a   :  { %v729_v20 = vpop.f32.mrf.mxu1 }
 0x34b   :  { %v440_v24 = vmax.f32 %v436_v18, 0.0 }
 0x34d   :  { %v444_v26 = vadd.f32 %v442_v23, %v440_v24 }
 0x34f   :  { %v445_v27 = vpack.c.bf16 %v444_v26, %v443_v25 }
 0x351   :  { %747 = vmatmul.mubr.bf16.vlgmr.msra.gmra.mxu0 %v445_v27 }
 0x411   :  { %v548_v28 = vpop.f32.mrf.mxu0 }
 0x412   :  { %v549_v32 = vadd.f32 %v548_v28, %v465_v29 }
 0x413   :  { %v748_v30 = vpop.f32.mrf.mxu0 }
 0x415   :  { %v551_v31 = vpop.f32.mrf.mxu0 }
 0x416   :  { %v552_v33 = vadd.f32 %v551_v31, %v465_v29 }
 0x417   :  { %v749_v34 = vpop.f32.mrf.mxu0 }
 0x418   :  { %v624_v35 = vpack.c.bf16 %v552_v33, %v549_v32 }
 0x41a   :  { %625 = vst [vmem:[#allocation7] sm:$0xff] %v624_v35  }
 0x41b   :  { %843 = shalt.err (!%p840_p0)
}
 0x41c   :  { %576 = dma.vmem_to_hbm [thread:$0]  %s571_s1, 128, %s956_s2, [#allocation4], %s862_s19, %s862_s19, %s863_s20  }
 0x41d   :  { %856 = dma.done.wait [#allocation4], 128  }
 0x41e   :  { %857 = vsyncadd [#allocation4], 4294967168 }
 0x41f   :  { %580 = vsyncpa [#allocation3], 1 }
 0x420   :  { %581 = vsyncpa [#allocation6], 1 }
 0x421   :  { %582 = vsyncpa [#allocation4], 1 }

</bundles_post_ra>
